<compile_context>
chip_gen: v7x
topology: tpu7x:2x2x1
jax: 0.10.0
libtpu: 0.0.40
codegen_flags: <defaults>
</compile_context>

<pallas_src>
import functools

import jax
import jax.numpy as jnp
from jax.experimental import pallas as pl
from jax.experimental.pallas import tpu as pltpu


def _round_up(x, m):
    return (x + m - 1) // m * m


def _nbytes(a):
    return int(a.size) * a.dtype.itemsize


def _vmem_capacity_bytes():
    """Physical VMEM of the local chip; conservative 64 MiB (v7x) if unknown."""
    try:
        info = pltpu.get_tpu_info()
        for name in ("vmem_capacity_bytes", "vmem_bytes", "vmem_size_bytes"):
            v = getattr(info, name, None)
            if v:
                return int(v)
    except Exception:
        pass
    return 64 * 1024 * 1024


def _pick_tm(B):
    """Batch tile: f32-sublane aligned, >=2 grid steps for B>=32 (v7x has 2 TCs)."""
    if B >= 512:
        return 256
    if B >= 32:
        return _round_up(-(-B // 2), 16)     # bf16 sublane packing -> multiple of 16
    return _round_up(B, 8)


def _pick_tile(dim, target):
    """Largest multiple of 128 that divides `dim` and is <= target."""
    best, t = 128, 128
    while t <= min(dim, target):
        if dim % t == 0:
            best = t
        t += 128
    return best


# ---------------------------------------------------------------------------
# Fused path: all folded weights VMEM-resident, grid only over the batch.
# ---------------------------------------------------------------------------

def _fused_kernel(x_ref, wf_ref, w2_ref, c_ref, o_ref, *, dout_p):
    # x_ref:  [TM, Din_p]        f32 (cast to bf16 here -> no extra HBM pass on x)
    # wf_ref: [Din_p, 2*Dout_p]  bf16  (concat: [proj | fc1*bn1_scale]) -- VMEM resident
    # w2_ref: [Dout_p, Dout_p]   bf16  (fc2 * bn2_scale)                -- VMEM resident
    # c_ref:  [8, Dout_p]        f32   row0 = bn1 shift, row1 = bn2 shift + proj bias
    x = x_ref[...].astype(jnp.bfloat16)

    # one MXU pass for the two matmuls sharing LHS x
    fused = jnp.dot(x, wf_ref[...], preferred_element_type=jnp.float32)

    identity = fused[:, :dout_p]                              # residual projection
    h = jnp.maximum(fused[:, dout_p:] + c_ref[0:1, :], 0.0)   # fc1 -> bn1 -> ReLU
    # dropout: identity in eval mode

    o = jnp.dot(h.astype(jnp.bfloat16), w2_ref[...],
                preferred_element_type=jnp.float32)           # fc2 -> bn2 (scale folded)
    o = o + c_ref[1:2, :] + identity                          # shift(+proj bias) + residual
    o_ref[...] = jnp.maximum(o, 0.0).astype(o_ref.dtype)      # ReLU (dropout: identity)


def _fused_forward(x_p, wf, w2, c, tm, din_p, dout_p, vmem_limit):
    b_pad = x_p.shape[0]
    return pl.pallas_call(
        functools.partial(_fused_kernel, dout_p=dout_p),
        out_shape=jax.ShapeDtypeStruct((b_pad, dout_p), jnp.bfloat16),
        grid=(b_pad // tm,),
        in_specs=[
            pl.BlockSpec((tm, din_p), lambda i: (i, 0)),          # x tiles (pipelined)
            pl.BlockSpec(memory_space=pltpu.MemorySpace.VMEM),    # fused W, single copy
            pl.BlockSpec(memory_space=pltpu.MemorySpace.VMEM),    # W2, single copy
            pl.BlockSpec(memory_space=pltpu.MemorySpace.VMEM),    # packed shifts
        ],
        out_specs=pl.BlockSpec((tm, dout_p), lambda i: (i, 0)),
        compiler_params=pltpu.CompilerParams(
            dimension_semantics=("parallel",),
            vmem_limit_bytes=vmem_limit,
        ),
    )(x_p, wf, w2, c)


# ---------------------------------------------------------------------------
# Tiled fallback path: weights too large for VMEM -> classic M/N/K-tiled matmuls.
# ---------------------------------------------------------------------------

def _mm_kernel(x_ref, w_ref, c_ref, o_ref, acc_ref, *, relu):
    k = pl.program_id(2)

    @pl.when(k == 0)
    def _init():
        acc_ref[...] = jnp.zeros_like(acc_ref)

    acc_ref[...] += jnp.dot(x_ref[...].astype(jnp.bfloat16), w_ref[...],
                            preferred_element_type=jnp.float32)

    @pl.when(k == pl.num_programs(2) - 1)
    def _fin():
        o = acc_ref[...] + c_ref[...]
        if relu:
            o = jnp.maximum(o, 0.0)
        o_ref[...] = o.astype(o_ref.dtype)


def _mm_res_kernel(x_ref, w_ref, c_ref, r_ref, o_ref, acc_ref):
    k = pl.program_id(2)

    @pl.when(k == 0)
    def _init():
        acc_ref[...] = jnp.zeros_like(acc_ref)

    acc_ref[...] += jnp.dot(x_ref[...].astype(jnp.bfloat16), w_ref[...],
                            preferred_element_type=jnp.float32)

    @pl.when(k == pl.num_programs(2) - 1)
    def _fin():
        o = acc_ref[...] + c_ref[...] + r_ref[...].astype(jnp.float32)
        o_ref[...] = jnp.maximum(o, 0.0).astype(o_ref.dtype)


def _tiled_matmul(x, w, c, *, relu, tm, tn, tk, vmem_limit, residual=None):
    m, _ = x.shape
    _, n = w.shape
    grid = (m // tm, n // tn, x.shape[1] // tk)

    in_specs = [
        pl.BlockSpec((tm, tk), lambda i, j, k: (i, k)),
        pl.BlockSpec((tk, tn), lambda i, j, k: (k, j)),
        pl.BlockSpec((1, tn), lambda i, j, k: (0, j)),
    ]
    args = [x, w, c]
    if residual is not None:
        in_specs.append(pl.BlockSpec((tm, tn), lambda i, j, k: (i, j)))
        args.append(residual)
        kern = _mm_res_kernel
    else:
        kern = functools.partial(_mm_kernel, relu=relu)

    return pl.pallas_call(
        kern,
        out_shape=jax.ShapeDtypeStruct((m, n), jnp.bfloat16),
        grid=grid,
        in_specs=in_specs,
        out_specs=pl.BlockSpec((tm, tn), lambda i, j, k: (i, j)),
        scratch_shapes=[pltpu.VMEM((tm, tn), jnp.float32)],
        compiler_params=pltpu.CompilerParams(
            dimension_semantics=("parallel", "parallel", "arbitrary"),
            vmem_limit_bytes=vmem_limit,
        ),
    )(*args)


def _tiled_forward(x_p, wf, w2, c, tm, din_p, dout_p, vmem_limit):
    wp_pad = wf[:, :dout_p]          # one-time slices (outside the kernels)
    w1_pad = wf[:, dout_p:]
    c1 = c[0:1, :]
    c2 = c[1:2, :]                   # bn2 shift + proj bias (already folded)
    zero_c = jnp.zeros_like(c1)

    tn = _pick_tile(dout_p, 512)
    tk1 = _pick_tile(din_p, 512)
    tk2 = _pick_tile(dout_p, 512)

    ident = _tiled_matmul(x_p, wp_pad, zero_c, relu=False,
                          tm=tm, tn=tn, tk=tk1, vmem_limit=vmem_limit)
    h = _tiled_matmul(x_p, w1_pad, c1, relu=True,
                      tm=tm, tn=tn, tk=tk1, vmem_limit=vmem_limit)
    return _tiled_matmul(h, w2, c2, relu=True, residual=ident,
                         tm=tm, tn=tn, tk=tk2, vmem_limit=vmem_limit)


# ---------------------------------------------------------------------------
# Public wrapper
# ---------------------------------------------------------------------------

def residual_mlp_block(x, kp, out_dim, *, force_tiled=False):
    """Fused ResidualMLPBlock forward on TPU via Pallas (eval semantics)."""
    wf, w2, c = kp['wf'], kp['w2'], kp['c']
    B, Din = x.shape
    din_p = wf.shape[0]
    dout_p = w2.shape[0]

    tm = _pick_tm(B)
    b_pad = _round_up(B, tm)

    # Pad only when actually needed; bf16 cast happens inside the kernel, so there
    # is no standalone cast pass over x in HBM.
    if (b_pad != B) or (din_p != Din):
        x = jnp.pad(x.astype(jnp.float32), ((0, b_pad - B), (0, din_p - Din)))

    # Generation-aware VMEM budget (≈100 MiB on v5e/v6e, ≈50 MiB on v7x).
    vmem_cap = int(_vmem_capacity_bytes() * 0.78)

    est = (_nbytes(wf) + _nbytes(w2) + _nbytes(c)   # weights: single resident copy
           + 2 * tm * din_p * 4                     # x tiles (f32, double-buffered)
           + 2 * tm * dout_p * 2                    # bf16 out tiles (double-buffered)
           + 6 * tm * dout_p * 4)                   # f32 temps (fused is 2*Dout wide)

    if force_tiled or est > vmem_cap:
        out_p = _tiled_forward(x, wf, w2, c, tm, din_p, dout_p, vmem_cap)
    else:
        out_p = _fused_forward(x, wf, w2, c, tm, din_p, dout_p, vmem_cap)

    return out_p[:B, :out_dim].astype(jnp.float32)


# ---------------------------------------------------------------------------
# Parameter construction / preparation / reference
# ---------------------------------------------------------------------------

def make_params(key, in_dim, out_dim):
    """Deterministic raw parameters matching the PyTorch __init__."""
    k1, k2, k3, kb1, kb2, kbp = jax.random.split(key, 6)

    # fc1 / fc2: kaiming_normal_(nonlinearity='relu') -> std = sqrt(2 / fan_in)
    w1 = jax.random.normal(k1, (out_dim, in_dim), jnp.float32) * jnp.sqrt(2.0 / in_dim)
    w2 = jax.random.normal(k2, (out_dim, out_dim), jnp.float32) * jnp.sqrt(2.0 / out_dim)
    # proj: xavier_uniform_ -> limit = sqrt(6 / (fan_in + fan_out))
    lim_p = jnp.sqrt(6.0 / (in_dim + out_dim))
    wp = jax.random.uniform(k3, (out_dim, in_dim), jnp.float32, -lim_p, lim_p)

    # biases: PyTorch Linear default U(-1/sqrt(fan_in), 1/sqrt(fan_in))
    b1 = jax.random.uniform(kb1, (out_dim,), jnp.float32,
                            -1.0 / jnp.sqrt(in_dim), 1.0 / jnp.sqrt(in_dim))
    b2 = jax.random.uniform(kb2, (out_dim,), jnp.float32,
                            -1.0 / jnp.sqrt(out_dim), 1.0 / jnp.sqrt(out_dim))
    bp = jax.random.uniform(kbp, (out_dim,), jnp.float32,
                            -1.0 / jnp.sqrt(in_dim), 1.0 / jnp.sqrt(in_dim))

    # BatchNorm1d defaults: gamma=1, beta=0, running_mean=0, running_var=1
    return dict(
        w1=w1, b1=b1, w2=w2, b2=b2, wp=wp, bp=bp,
        gamma1=jnp.ones((out_dim,)), beta1=jnp.zeros((out_dim,)),
        mean1=jnp.zeros((out_dim,)), var1=jnp.ones((out_dim,)),
        gamma2=jnp.ones((out_dim,)), beta2=jnp.zeros((out_dim,)),
        mean2=jnp.zeros((out_dim,)), var2=jnp.ones((out_dim,)),
    )


def prepare_kernel_params(p, eps=1e-5):
    """Fold eval-mode BN into weights/shifts, pad lane-dense, cast bf16."""
    out_dim, in_dim = p['w1'].shape
    din_p = _round_up(in_dim, 128)
    dout_p = _round_up(out_dim, 128)

    scale1 = p['gamma1'] / jnp.sqrt(p['var1'] + eps)
    shift1 = (p['b1'] - p['mean1']) * scale1 + p['beta1']
    scale2 = p['gamma2'] / jnp.sqrt(p['var2'] + eps)
    shift2 = (p['b2'] - p['mean2']) * scale2 + p['beta2']

    if p.get('wp') is not None:
        wp_t = p['wp'].T                         # [in, out]
        bp = p['bp']
    else:                                        # in_dim == out_dim: identity residual
        wp_t = jnp.eye(in_dim, out_dim, dtype=jnp.float32)
        bp = jnp.zeros((out_dim,), jnp.float32)

    w1_t = p['w1'].T * scale1[None, :]           # [in, out], bn1 scale folded
    w2_t = p['w2'].T * scale2[None, :]           # [out, out], bn2 scale folded

    def pad2(a, r, c):
        return jnp.zeros((r, c), a.dtype).at[:a.shape[0], :a.shape[1]].set(a)

    wf = jnp.concatenate([pad2(wp_t, din_p, dout_p),
                          pad2(w1_t, din_p, dout_p)], axis=1).astype(jnp.bfloat16)
    w2 = pad2(w2_t, dout_p, dout_p).astype(jnp.bfloat16)

    # Single sublane-dense per-feature-shift operand:
    #   row 0 = bn1 shift, row 1 = bn2 shift + proj bias (folded), rows 2..7 = 0.
    c = jnp.zeros((8, dout_p), jnp.float32)
    c = c.at[0, :out_dim].set(shift1.astype(jnp.float32))
    c = c.at[1, :out_dim].set((shift2 + bp).astype(jnp.float32))
    return dict(wf=wf, w2=w2, c=c)


def reference_forward(x, p, eps=1e-5):
    """Pure-JAX f32 reference following the PyTorch module (eval mode)."""
    identity = x @ p['wp'].T + p['bp']
    h = x @ p['w1'].T + p['b1']
    h = (h - p['mean1']) / jnp.sqrt(p['var1'] + eps) * p['gamma1'] + p['beta1']
    h = jnp.maximum(h, 0.0)
    o = h @ p['w2'].T + p['b2']
    o = (o - p['mean2']) / jnp.sqrt(p['var2'] + eps) * p['gamma2'] + p['beta2']
    o = o + identity
    return jnp.maximum(o, 0.0)


if __name__ == "__main__":
    IN_DIM, OUT_DIM, BATCH = 16, 32, 8

    key = jax.random.PRNGKey(0)
    kx, kp_key = jax.random.split(key)
    x = jax.random.normal(kx, (BATCH, IN_DIM), jnp.float32)

    params = make_params(kp_key, IN_DIM, OUT_DIM)
    kparams = prepare_kernel_params(params)
    ref = reference_forward(x, params)

    # Fused (weights-resident) path.
    out = jax.block_until_ready(residual_mlp_block(x, kparams, OUT_DIM))
    assert out.shape == (BATCH, OUT_DIM)
    # bf16 MXU inputs / bf16 writeback (f32 accumulation) -> loosened tolerance.
    assert jnp.allclose(out, ref, rtol=5e-2, atol=5e-2), "fused path mismatch"

    # Tiled fallback path (exercised here at small shape for validation).
    out_t = jax.block_until_ready(
        residual_mlp_block(x, kparams, OUT_DIM, force_tiled=True))
    assert out_t.shape == (BATCH, OUT_DIM)
    assert jnp.allclose(out_t, ref, rtol=5e-2, atol=5e-2), "tiled path mismatch"

    print("KERNEL_OK")
</pallas_src>

<mosaic_0001>
module attributes {stable_mosaic.version = 11 : i64} {
  func.func @_fused_kernel(%arg0: i32, %arg1: memref<8x128xf32, #tpu.memory_space<vmem>>, %arg2: memref<128x256xbf16, #tpu.memory_space<vmem>>, %arg3: memref<128x128xbf16, #tpu.memory_space<vmem>>, %arg4: memref<8x128xf32, #tpu.memory_space<vmem>>, %arg5: memref<8x128xbf16, #tpu.memory_space<vmem>>) attributes {dimension_semantics = [#tpu.dimension_semantics<parallel>], iteration_bounds = array<i64: 1>, scalar_prefetch = 0 : i64, scratch_operands = 0 : i64, tpu.core_type = #tpu.core_type<tc>, window_params = [{transform_indices = @transform_0, window_bounds = array<i64: 8, 128>}, {pipeline_mode = #tpu.pipeline_mode<synchronous>, transform_indices = @transform_1, window_bounds = array<i64: 128, 256>}, {pipeline_mode = #tpu.pipeline_mode<synchronous>, transform_indices = @transform_2, window_bounds = array<i64: 128, 128>}, {pipeline_mode = #tpu.pipeline_mode<synchronous>, transform_indices = @transform_3, window_bounds = array<i64: 8, 128>}, {transform_indices = @transform_4, window_bounds = array<i64: 8, 128>}]} {
    %c0 = arith.constant 0 : index
    %c0_0 = arith.constant 0 : index
    %0 = vector.load %arg1[%c0, %c0_0] : memref<8x128xf32, #tpu.memory_space<vmem>>, vector<8x128xf32>
    %1 = arith.truncf %0 : vector<8x128xf32> to vector<8x128xbf16>
    %c0_1 = arith.constant 0 : index
    %c0_2 = arith.constant 0 : index
    %2 = vector.load %arg2[%c0_1, %c0_2] : memref<128x256xbf16, #tpu.memory_space<vmem>>, vector<128x256xbf16>
    %cst = arith.constant dense<0.000000e+00> : vector<8x256xf32>
    %3 = tpu.matmul %1, %2, %cst {dimension_numbers = #tpu.dot_dimension_numbers<[1], [0], [0], [1], [0, 0, 1, 1], [], []>} : vector<8x128xbf16>, vector<128x256xbf16>, vector<8x256xf32> -> vector<8x256xf32>
    %4 = vector.extract_strided_slice %3 {offsets = [0, 0], sizes = [8, 128], strides = [1, 1]} : vector<8x256xf32> to vector<8x128xf32>
    %5 = vector.extract_strided_slice %3 {offsets = [0, 128], sizes = [8, 128], strides = [1, 1]} : vector<8x256xf32> to vector<8x128xf32>
    %c0_3 = arith.constant 0 : index
    %c0_4 = arith.constant 0 : index
    %6 = vector.load %arg4[%c0_3, %c0_4] : memref<8x128xf32, #tpu.memory_space<vmem>>, vector<1x128xf32>
    %7 = vector.broadcast %6 : vector<1x128xf32> to vector<8x128xf32>
    %8 = arith.addf %5, %7 : vector<8x128xf32>
    %cst_5 = arith.constant 0.000000e+00 : f32
    %9 = vector.broadcast %cst_5 : f32 to vector<8x128xf32>
    %10 = arith.maximumf %8, %9 : vector<8x128xf32>
    %11 = arith.truncf %10 : vector<8x128xf32> to vector<8x128xbf16>
    %c0_6 = arith.constant 0 : index
    %c0_7 = arith.constant 0 : index
    %12 = vector.load %arg3[%c0_6, %c0_7] : memref<128x128xbf16, #tpu.memory_space<vmem>>, vector<128x128xbf16>
    %cst_8 = arith.constant dense<0.000000e+00> : vector<8x128xf32>
    %13 = tpu.matmul %11, %12, %cst_8 {dimension_numbers = #tpu.dot_dimension_numbers<[1], [0], [0], [1], [0, 0, 1, 1], [], []>} : vector<8x128xbf16>, vector<128x128xbf16>, vector<8x128xf32> -> vector<8x128xf32>
    %c1 = arith.constant 1 : index
    %c0_9 = arith.constant 0 : index
    %14 = vector.load %arg4[%c1, %c0_9] : memref<8x128xf32, #tpu.memory_space<vmem>>, vector<1x128xf32>
    %15 = vector.broadcast %14 : vector<1x128xf32> to vector<8x128xf32>
    %16 = arith.addf %13, %15 : vector<8x128xf32>
    %17 = arith.addf %16, %4 : vector<8x128xf32>
    %cst_10 = arith.constant 0.000000e+00 : f32
    %18 = vector.broadcast %cst_10 : f32 to vector<8x128xf32>
    %19 = arith.maximumf %17, %18 : vector<8x128xf32>
    %20 = arith.truncf %19 : vector<8x128xf32> to vector<8x128xbf16>
    %c0_11 = arith.constant 0 : index
    %c0_12 = arith.constant 0 : index
    %21 = vector.load %arg5[%c0_11, %c0_12] : memref<8x128xbf16, #tpu.memory_space<vmem>>, vector<8x128xbf16>
    tpu.vector_store %arg5[%c0_11, %c0_12], %20 {strides = array<i32>} : memref<8x128xbf16, #tpu.memory_space<vmem>>, vector<8x128xbf16>,
    return
  }
  func.func @transform_0(%arg0: i32) -> (i32, i32) {
    %c0_i32 = arith.constant 0 : i32
    %c0_i32_0 = arith.constant 0 : i32
    return %arg0, %c0_i32 : i32, i32
  }
  func.func @transform_1(%arg0: i32) -> (i32, i32) {
    %c0_i32 = arith.constant 0 : i32
    %c0_i32_0 = arith.constant 0 : i32
    %c0_i32_1 = arith.constant 0 : i32
    return %c0_i32, %c0_i32_0 : i32, i32
  }
  func.func @transform_2(%arg0: i32) -> (i32, i32) {
    %c0_i32 = arith.constant 0 : i32
    %c0_i32_0 = arith.constant 0 : i32
    %c0_i32_1 = arith.constant 0 : i32
    return %c0_i32, %c0_i32_0 : i32, i32
  }
  func.func @transform_3(%arg0: i32) -> (i32, i32) {
    %c0_i32 = arith.constant 0 : i32
    %c0_i32_0 = arith.constant 0 : i32
    %c0_i32_1 = arith.constant 0 : i32
    return %c0_i32, %c0_i32_0 : i32, i32
  }
  func.func @transform_4(%arg0: i32) -> (i32, i32) {
    %c0_i32 = arith.constant 0 : i32
    %c0_i32_0 = arith.constant 0 : i32
    return %arg0, %c0_i32 : i32, i32
  }
}

</mosaic_0001>

<bundles_post_ra>
// kernel: tpu_custom_call.1
= control target key start
LH: loop header
LB: loop body
LE: loop exit
PB: predicated region body
PF: predicated region fallthrough
CT: control target
= control target key end

     0   :  { %9 = vsyncpa [#allocation3], 0  ;;  %s616_s0 = inlined_call_operand.hbm [shape: f32[8,128], index: 0, kind: input, shape index: {}]   ;;  %s617_s1 = inlined_call_operand.hbm [shape: bf16[128,256], index: 1, kind: input, shape index: {}]   ;;  %s618_s2 = inlined_call_operand.hbm [shape: bf16[128,128], index: 2, kind: input, shape index: {}]   ;;  %s619_s3 = inlined_call_operand.vmem [shape: f32[8,128], index: 3, kind: input, shape index: {}]   ;;  %s620_s4 = inlined_call_operand.hbm [shape: bf16[8,128], index: 4, kind: output, shape index: {}]  }
   0x1   :  { %10 = vsyncpa [#allocation6], 0 }
   0x2   :  { %11 = vsyncpa [#allocation4], 0  ;;  %s526_s15 = smov [#allocation5]   ;;  %s432_s19 = scalar_lea.hbm %s617_s1, 2048 }
   0x3   :  { %s27_s16 = sshll.u32 %s526_s15, 4  ;;  %p433_p0 = scmp.ne.s32.totalorder %s617_s1, %s432_s19  ;;  %s28_s16 = int_to_ptr.vmem [resolvable:$true] %s27_s16 }
   0x4   :  { %p436_p1 = scmp.lt.u32.totalorder %s432_s19, %s617_s1 }
   0x6   :  { %p438_p2 = pnand %p436_p1, %p433_p0 }
   0x8   :  { %441 = shalt.err (!%p438_p2)
}
   0x9   :  { %s442_s24 = scalar_lea.vmem %s28_s16, 2048  ;;  %p447_p4 = scmp.lt.s32.totalorder %s28_s16, %s28_s16 }
   0xa   :  { %p443_p3 = scmp.ne.s32.totalorder %s28_s16, %s442_s24  ;;  %p448_p5 = scmp.lt.s32.totalorder %s442_s24, %s442_s24 }
   0xc   :  { %p449_p6 = por %p448_p5, %p447_p4 }
   0xe   :  { %p450_p7 = pnand %p449_p6, %p443_p3 }
  0x10   :  { %453 = shalt.err (!%p450_p7)
}
  0x11   :  { %s527_s25 = smov 128   ;;  %s528_s26 = smov 8  }
  0x12   :  { %33 = dma.hbm_to_vmem [thread:$0]  %s617_s1, 2048, %s28_s16, [#allocation6], %s527_s25, %s527_s25, %s528_s26  }
  0x13   :  { %s529_s29 = smov [#allocation2]   ;;  %s530_s5 = smov [#allocation7]  }
  0x14   :  { %s18_s30 = sshll.u32 %s529_s29, 4  ;;  %s39_s6 = sshll.u32 %s530_s5, 4  ;;  %s19_s30 = int_to_ptr.vmem [resolvable:$true] %s18_s30  ;;  %s40_s6 = int_to_ptr.vmem [resolvable:$true] %s39_s6 }
  0x15   :  { %s454_s9 = scalar_lea.hbm %s616_s0, 128 }
  0x16   :  { %p455_p8 = scmp.ne.s32.totalorder %s616_s0, %s454_s9  ;;  %p458_p9 = scmp.lt.u32.totalorder %s454_s9, %s616_s0 }
  0x18   :  { %p460_p10 = pnand %p458_p9, %p455_p8 }
  0x1a   :  { %463 = shalt.err (!%p460_p10)
}
  0x1b   :  { %s464_s1 = scalar_lea.vmem %s19_s30, 128  ;;  %p469_p12 = scmp.lt.s32.totalorder %s19_s30, %s19_s30 }
  0x1c   :  { %p465_p11 = scmp.ne.s32.totalorder %s19_s30, %s464_s1  ;;  %p470_p13 = scmp.lt.s32.totalorder %s464_s1, %s464_s1 }
  0x1e   :  { %p471_p0 = por %p470_p13, %p469_p12 }
  0x20   :  { %p472_p1 = pnand %p471_p0, %p465_p11 }
  0x22   :  { %475 = shalt.err (!%p472_p1)
}
  0x23   :  { %21 = dma.hbm_to_vmem [thread:$0]  %s616_s0, 128, %s19_s30, [#allocation3]  }
  0x24   :  { %s476_s18 = scalar_lea.hbm %s618_s2, 1024 }
  0x25   :  { %p477_p2 = scmp.ne.s32.totalorder %s618_s2, %s476_s18  ;;  %p480_p3 = scmp.lt.u32.totalorder %s476_s18, %s618_s2 }
  0x27   :  { %p482_p4 = pnand %p480_p3, %p477_p2 }
  0x29   :  { %485 = shalt.err (!%p482_p4)
}
  0x2a   :  { %s486_s23 = scalar_lea.vmem %s40_s6, 1024  ;;  %p491_p6 = scmp.lt.s32.totalorder %s40_s6, %s40_s6 }
  0x2b   :  { %p487_p5 = scmp.ne.s32.totalorder %s40_s6, %s486_s23  ;;  %p492_p7 = scmp.lt.s32.totalorder %s486_s23, %s486_s23 }
  0x2d   :  { %p493_p8 = por %p492_p7, %p491_p6 }
  0x2f   :  { %p494_p9 = pnand %p493_p8, %p487_p5 }
  0x31   :  { %497 = shalt.err (!%p494_p9)
}
  0x32   :  { %s531_s0 = smov 64   ;;  %s532_s24 = smov 4  }
  0x33   :  { %45 = dma.hbm_to_vmem [thread:$0]  %s618_s2, 1024, %s40_s6, [#allocation6], %s531_s0, %s531_s0, %s532_s24  }
  0x34   :  { %520 = dma.done.wait [#allocation3], 128  }
  0x35   :  { %521 = vsyncadd [#allocation3], 4294967168 }
  0x36   :  { %522 = dma.done.wait [#allocation6], 3072  }
  0x37   :  { %523 = vsyncadd [#allocation6], 4294964224  ;;  %v533_v0 = vmov 0   ;;  %v534_v1 = vmov 0.0   ;;  %v400_v2 = vld [vmem:[#allocation5 + $0x4] ss:$8 sps:$4 sm:$0xff]  }
  0x38   :  { %188 = vmatprep.mubr.bf16.mxu0 %v533_v0  ;;  %369 = vmatprep.subr.bf16.mxu1 %v534_v1  ;;  %v402_v3 = vld [vmem:[#allocation5] ss:$8 sps:$4 sm:$0xff]   ;;  %v403_v4 = vld [vmem:[#allocation5 + $0x14] ss:$8 sps:$4 sm:$0xff]   ;;  %v405_v5 = vld [vmem:[#allocation5 + $0x10] ss:$8 sps:$4 sm:$0xff]  }
  0x39   :  { %156 = vmatprep.subr.bf16.mxu0 %v400_v2  ;;  %v406_v6 = vld [vmem:[#allocation5 + $0x24] ss:$8 sps:$4 sm:$0xff]   ;;  %v408_v7 = vld [vmem:[#allocation5 + $0x20] ss:$8 sps:$4 sm:$0xff]   ;;  %v409_v8 = vld [vmem:[#allocation5 + $0x34] ss:$8 sps:$4 sm:$0xff]  }
  0x3a   :  { %157 = vmatpush1.bf16.msra.mxu0 %v402_v3  ;;  %v411_v9 = vld [vmem:[#allocation5 + $0x30] ss:$8 sps:$4 sm:$0xff]   ;;  %v424_v10 = vld [vmem:[#allocation7] sm:$0xff]   ;;  %v425_v12 = vld [vmem:[#allocation7 + $0x8] sm:$0xff]   ;;  %vm535_vm0 = vmmov 0   ;;  %s536_s30 = smov [#allocation8]  }
  0x3b   :  { %158 = vmatprep.subr.bf16.mxu0 %v403_v4  ;;  %v412_v11 = vld [vmem:[#allocation5 + $0x44] ss:$8 sps:$4 sm:$0xff]   ;;  %370 = vmatpush3.bf16.msra.mxu1 %v424_v10  ;;  %v414_v13 = vld [vmem:[#allocation5 + $0x40] ss:$8 sps:$4 sm:$0xff]   ;;  %v415_v14 = vld [vmem:[#allocation5 + $0x54] ss:$8 sps:$4 sm:$0xff]  }
  0x3c   :  { %371 = vmatprep.subr.bf16.mxu1 %v534_v1  ;;  %v426_v15 = vld [vmem:[#allocation7 + $0x10] sm:$0xff]   ;;  %v418_v17 = vld [vmem:[#allocation5 + $0x64] ss:$8 sps:$4 sm:$0xff]   ;;  %v427_v18 = vld [vmem:[#allocation7 + $0x18] sm:$0xff]   ;;  %385 = vmatprep.mubr.msk.bf16.mxu1 %vm535_vm0, %v534_v1  ;;  %s324_s5 = sshll.u32 %s536_s30, 4  ;;  %s325_s5 = int_to_ptr.vmem [resolvable:$true] %s324_s5 }
  0x3d   :  { %v417_v16 = vld [vmem:[#allocation5 + $0x50] ss:$8 sps:$4 sm:$0xff]   ;;  %v420_v19 = vld [vmem:[#allocation5 + $0x60] ss:$8 sps:$4 sm:$0xff]   ;;  %v421_v20 = vld [vmem:[#allocation5 + $0x74] ss:$8 sps:$4 sm:$0xff]   ;;  %p503_p11 = scmp.lt.s32.totalorder %s325_s5, %s325_s5 }
  0x3e   :  { %159 = vmatpush1.bf16.msra.mxu0 %v405_v5  ;;  %v428_v21 = vld [vmem:[#allocation7 + $0x20] sm:$0xff]   ;;  %v423_v22 = vld [vmem:[#allocation5 + $0x70] ss:$8 sps:$4 sm:$0xff]   ;;  %v429_v24 = vld [vmem:[#allocation7 + $0x28] sm:$0xff]   ;;  %s498_s6 = scalar_lea.vmem %s325_s5, 64 }
  0x3f   :  { %160 = vmatprep.subr.bf16.mxu0 %v406_v6  ;;  %372 = vmatpush3.bf16.msra.mxu1 %v425_v12  ;;  %v58_v23 = vld [vmem:[#allocation2] sm:$0xff]  ;;  %v430_v26 = vld [vmem:[#allocation7 + $0x30] sm:$0xff]   ;;  %p499_p10 = scmp.ne.s32.totalorder %s325_s5, %s498_s6  ;;  %p504_p12 = scmp.lt.s32.totalorder %s498_s6, %s498_s6 }
  0x40   :  { %373 = vmatprep.subr.bf16.mxu1 %v534_v1  ;;  %v59_v25 = vpack.c.bf16 %v58_v23, %v58_v23  ;;  %v431_v27 = vld [vmem:[#allocation7 + $0x38] sm:$0xff]  }
  0x41   :  { %v350_v28 = vld [vmem:[%s619_s3] ss:$0 sm:$0xff]  ;;  %v351_v36 = vld [vmem:[%s619_s3 + $0x1] ss:$0 sm:$0xff]  ;;  %p505_p13 = por %p504_p12, %p503_p11 }
  0x42   :  { %161 = vmatpush1.bf16.msra.mxu0 %v408_v7 }
  0x43   :  { %162 = vmatprep.subr.bf16.mxu0 %v409_v8  ;;  %374 = vmatpush3.bf16.msra.mxu1 %v426_v15  ;;  %p506_p0 = pnand %p505_p13, %p499_p10 }
  0x44   :  { %375 = vmatprep.subr.bf16.mxu1 %v534_v1 }
  0x46   :  { %163 = vmatpush1.bf16.msra.mxu0 %v411_v9 }
  0x47   :  { %164 = vmatprep.subr.bf16.mxu0 %v412_v11  ;;  %376 = vmatpush3.bf16.msra.mxu1 %v427_v18 }
  0x48   :  { %377 = vmatprep.subr.bf16.mxu1 %v534_v1 }
  0x4a   :  { %165 = vmatpush1.bf16.msra.mxu0 %v414_v13 }
  0x4b   :  { %166 = vmatprep.subr.bf16.mxu0 %v415_v14  ;;  %378 = vmatpush3.bf16.msra.mxu1 %v428_v21 }
  0x4c   :  { %379 = vmatprep.subr.bf16.mxu1 %v534_v1 }
  0x4e   :  { %167 = vmatpush1.bf16.msra.mxu0 %v417_v16 }
  0x4f   :  { %168 = vmatprep.subr.bf16.mxu0 %v418_v17  ;;  %380 = vmatpush3.bf16.msra.mxu1 %v429_v24 }
  0x50   :  { %381 = vmatprep.subr.bf16.mxu1 %v534_v1 }
  0x52   :  { %169 = vmatpush1.bf16.msra.mxu0 %v420_v19 }
  0x53   :  { %170 = vmatprep.subr.bf16.mxu0 %v421_v20  ;;  %382 = vmatpush3.bf16.msra.mxu1 %v430_v26 }
  0x54   :  { %383 = vmatprep.subr.bf16.mxu1 %v534_v1 }
  0x56   :  { %171 = vmatpush1.bf16.msra.mxu0 %v423_v22 }
  0x57   :  { %384 = vmatpush3.bf16.msra.mxu1 %v431_v27 }
  0x59   :  { %189 = vmatmul.mubr.bf16.vlgmr.msra.gmra.mrb[0].mxu0 %v59_v25 }
 0x12c   :  { %v190_v29 = vpop.f32.mrb[0].mxu0 }
 0x12d   :  { %v192_v30 = vpop.f32.mrb[1].mxu0 }
 0x12e   :  { %v202_v31 = vadd.f32 %v350_v28, %v192_v30  ;;  %v194_v32 = vpop.f32.mrb[2].mxu0 }
 0x12f   :  { %v195_v33 = vpop.f32.mrb[3].mxu0 }
 0x130   :  { %v203_v34 = vmax.f32 %v202_v31, 0.0 }
 0x132   :  { %v204_v35 = vpack.c.bf16 %v203_v34, %v203_v34 }
 0x134   :  { %386 = vmatmul.mubr.bf16.vlgmr.msra.gmra.mrb[0].mxu1 %v204_v35 }
 0x207   :  { %v308_v37 = vpop.f32.mrb[0].mxu1 }
 0x208   :  { %v309_v38 = vadd.f32 %v351_v36, %v308_v37  ;;  %v387_v39 = vpop.f32.mrb[1].mxu1 }
 0x209   :  { %v311_v40 = vpop.f32.mrb[2].mxu1 }
 0x20a   :  { %v314_v41 = vadd.f32 %v309_v38, %v190_v29  ;;  %v388_v42 = vpop.f32.mrb[3].mxu1 }
 0x20c   :  { %v315_v43 = vmax.f32 %v314_v41, 0.0 }
 0x20e   :  { %v316_v44 = vpack.c.bf16 %v315_v43, %v315_v43 }
 0x210   :  { %317 = vst [vmem:[#allocation8] sm:$0xf] %v316_v44 }
 0x211   :  { %509 = shalt.err (!%p506_p0)
}
 0x212   :  { %s510_s8 = scalar_lea.hbm %s620_s4, 64 }
 0x213   :  { %p511_p1 = scmp.ne.s32.totalorder %s620_s4, %s510_s8  ;;  %p514_p2 = scmp.lt.u32.totalorder %s510_s8, %s620_s4 }
 0x215   :  { %p516_p3 = pnand %p514_p2, %p511_p1 }
 0x217   :  { %519 = shalt.err (!%p516_p3)
}
 0x218   :  { %327 = dma.vmem_to_hbm [thread:$0]  %s325_s5, 64, %s620_s4, [#allocation4]  }
 0x219   :  { %524 = dma.done.wait [#allocation4], 64  }
 0x21a   :  { %525 = vsyncadd [#allocation4], 4294967232 }
 0x21b   :  { %331 = vsyncpa [#allocation3], 1 }
 0x21c   :  { %332 = vsyncpa [#allocation6], 1 }
 0x21d   :  { %333 = vsyncpa [#allocation4], 1 }

</bundles_post_ra>
